<compile_context>
chip_gen: v7x
topology: tpu7x:2x2x1
jax: 0.10.0
libtpu: 0.0.40
codegen_flags: <defaults>
</compile_context>

<pallas_src>
import functools

import jax
import jax.numpy as jnp
from jax import lax
from jax.experimental import pallas as pl
from jax.experimental.pallas import tpu as pltpu

_LANES = 128
_SUBLANES = 8
# Per-input, per-pipeline-buffer byte budget for DMA blocks (dtype-aware).
_BLOCK_BYTES_TARGET = 2 * 1024 * 1024
# Cap so in-kernel f32 intermediates stay <= 4 MiB each for narrow dtypes.
_BLOCK_ROWS_CAP = 8192


def _round_up(x, m):
    return ((x + m - 1) // m) * m


def _wl1_kernel(x_ref, t_ref, w_ref, o_ref, *,
                rows, block_rows, per_core, needs_mask):
    # o_ref is an (8, 128) f32 partial-sum block, resident across the inner
    # ("arbitrary") grid axis; one such block per split / TensorCore.
    @pl.when(pl.program_id(1) == 0)
    def _():
        o_ref[...] = jnp.zeros_like(o_ref)

    # Upcast after the DMA so HBM traffic stays in the source dtype.
    x = x_ref[...].astype(jnp.float32)
    t = t_ref[...].astype(jnp.float32)
    w = w_ref[...].astype(jnp.float32)
    contrib = w * jnp.abs(x - t)

    if needs_mask:
        # Base-free iota compared against a scalar remaining-row count
        # (cheaper than adding the base into a full int block).  Mask the
        # final product, not an operand, so garbage NaN/Inf in OOB rows of
        # the partial block cannot leak into the sum.
        global_block = pl.program_id(0) * per_core + pl.program_id(1)
        remaining = rows - global_block * block_rows
        row_ids = lax.broadcasted_iota(jnp.int32, (block_rows, _LANES), 0)
        contrib = jnp.where(row_ids < remaining, contrib, 0.0)

    # VPU-only fold of the block into the (8, 128) vreg-shaped accumulator.
    o_ref[...] += jnp.sum(
        contrib.reshape(block_rows // _SUBLANES, _SUBLANES, _LANES), axis=0)


def weighted_l1_loss(inp, target, weight):
    """Pallas equivalent of torch.mean(weight * torch.abs(input - target))."""
    assert inp.shape == target.shape == weight.shape
    n = inp.size
    out_dtype = jnp.result_type(inp.dtype, target.dtype, weight.dtype)
    inv_count = 1.0 / float(n)

    x_flat = inp.reshape(-1)
    t_flat = target.reshape(-1)
    w_flat = weight.reshape(-1)

    n_body = (n // _LANES) * _LANES
    tail = n - n_body

    def _partial_sum(lo, hi):
        xs = lax.slice(x_flat, (lo,), (hi,)).astype(jnp.float32)
        ts = lax.slice(t_flat, (lo,), (hi,)).astype(jnp.float32)
        ws = lax.slice(w_flat, (lo,), (hi,)).astype(jnp.float32)
        return jnp.sum(ws * jnp.abs(xs - ts))

    if n_body == 0:
        # Tiny input (< 128 elements): not worth a kernel launch.
        return (_partial_sum(0, n) * inv_count).astype(out_dtype)

    if tail == 0:
        # Common case: pure bitcast reshape, zero extra HBM traffic.
        def to_2d(a):
            return a.reshape(-1, _LANES)
    else:
        # Rare ragged case: the <128-element tail is handled in plain JAX
        # below; the body slice still materializes one copy.
        # TODO(synk): a fully zero-copy ragged body needs 1D blocks/manual DMA.
        def to_2d(a):
            return lax.slice(a, (0,), (n_body,)).reshape(-1, _LANES)

    x2, t2, w2 = to_2d(x_flat), to_2d(t_flat), to_2d(w_flat)
    rows = x2.shape[0]

    itemsize = max(jnp.dtype(a.dtype).itemsize for a in (x2, t2, w2))
    block_rows_target = min(
        max(_BLOCK_BYTES_TARGET // (_LANES * itemsize), _SUBLANES),
        _BLOCK_ROWS_CAP)
    block_rows = min(block_rows_target, _round_up(rows, _SUBLANES))
    grid_len = pl.cdiv(rows, block_rows)

    # Split the block range across (up to) two TensorCores (v7x megacore);
    # on 1-TC chips the "parallel" axis simply iterates, at negligible cost.
    num_splits = 2 if grid_len >= 2 else 1
    per_core = pl.cdiv(grid_len, num_splits)
    needs_mask = (rows % block_rows != 0) or (num_splits * per_core != grid_len)

    def in_index(c, i):
        # Clamp padding steps (odd grid_len) to a valid block; their rows are
        # masked to zero in-kernel, so the duplicate read contributes nothing.
        return (jnp.minimum(c * per_core + i, grid_len - 1), 0)

    tile_spec = pl.BlockSpec((block_rows, _LANES), in_index)

    kernel = functools.partial(
        _wl1_kernel, rows=rows, block_rows=block_rows, per_core=per_core,
        needs_mask=needs_mask)

    partials = pl.pallas_call(
        kernel,
        out_shape=jax.ShapeDtypeStruct((num_splits * _SUBLANES, _LANES),
                                       jnp.float32),
        grid_spec=pltpu.PrefetchScalarGridSpec(
            num_scalar_prefetch=0,
            grid=(num_splits, per_core),
            in_specs=[tile_spec, tile_spec, tile_spec],
            # Lane-dense (8, 128) per-core partial-sum blocks; no shared
            # output is written by both cores.
            out_specs=pl.BlockSpec((_SUBLANES, _LANES), lambda c, i: (c, 0)),
        ),
        compiler_params=pltpu.CompilerParams(
            dimension_semantics=("parallel", "arbitrary"),
            # 3 inputs x 2 buffers x <=2 MiB blocks + f32 intermediates; keep
            # explicit headroom vs. v5e's 16 MiB default and v7x's 64 MiB VMEM.
            vmem_limit_bytes=48 * 1024 * 1024,
        ),
    )(x2, t2, w2)

    total = jnp.sum(partials)
    if tail:
        total = total + _partial_sum(n_body, n)
    return (total * inv_count).astype(out_dtype)


if __name__ == "__main__":
    key = jax.random.PRNGKey(0)
    k1, k2, k3 = jax.random.split(key, 3)

    # Small NCHW shape consistent with typical conv-style inputs.
    shape = (2, 4, 16, 16)
    inp = jax.random.normal(k1, shape, dtype=jnp.float32)
    target = jax.random.normal(k2, shape, dtype=jnp.float32)
    weight = jax.random.uniform(k3, shape, dtype=jnp.float32)

    loss = weighted_l1_loss(inp, target, weight)
    jax.block_until_ready(loss)

    ref = jnp.mean(weight * jnp.abs(inp - target))
    assert jnp.allclose(loss, ref, rtol=1e-6, atol=1e-6), (loss, ref)

    # Secondary check exercising the multi-block / two-core-split / masked
    # row-tail paths (still small: ~2.3 MiB f32 per tensor).
    shape2 = (8, 8, 96, 96)
    k4, k5, k6 = jax.random.split(jax.random.PRNGKey(0), 3)
    inp2 = jax.random.normal(k4, shape2, dtype=jnp.float32)
    target2 = jax.random.normal(k5, shape2, dtype=jnp.float32)
    weight2 = jax.random.uniform(k6, shape2, dtype=jnp.float32)

    loss2 = weighted_l1_loss(inp2, target2, weight2)
    jax.block_until_ready(loss2)
    ref2 = jnp.mean(weight2 * jnp.abs(inp2 - target2))
    assert jnp.allclose(loss2, ref2, rtol=1e-5, atol=1e-6), (loss2, ref2)

    print("KERNEL_OK")
</pallas_src>

<mosaic_0001>
module attributes {stable_mosaic.version = 11 : i64} {
  func.func @_wl1_kernel(%arg0: i32, %arg1: i32, %arg2: memref<16x128xf32, #tpu.memory_space<vmem>>, %arg3: memref<16x128xf32, #tpu.memory_space<vmem>>, %arg4: memref<16x128xf32, #tpu.memory_space<vmem>>, %arg5: memref<8x128xf32, #tpu.memory_space<vmem>>) attributes {dimension_semantics = [#tpu.dimension_semantics<parallel>, #tpu.dimension_semantics<arbitrary>], iteration_bounds = array<i64: 1, 1>, scalar_prefetch = 0 : i64, scratch_operands = 0 : i64, tpu.core_type = #tpu.core_type<tc>, window_params = [{transform_indices = @transform_0, window_bounds = array<i64: 16, 128>}, {transform_indices = @transform_1, window_bounds = array<i64: 16, 128>}, {transform_indices = @transform_2, window_bounds = array<i64: 16, 128>}, {transform_indices = @transform_3, window_bounds = array<i64: 8, 128>}]} {
    %c0_i32 = arith.constant 0 : i32
    %0 = arith.cmpi eq, %arg1, %c0_i32 : i32
    %1 = arith.extui %0 : i1 to i32
    %c0_i32_0 = arith.constant 0 : i32
    %2 = arith.cmpi ne, %1, %c0_i32_0 : i32
    scf.if %2 {
      %cst_10 = arith.constant 0.000000e+00 : f32
      %14 = vector.broadcast %cst_10 : f32 to vector<8x128xf32>
      %c0_11 = arith.constant 0 : index
      %c0_12 = arith.constant 0 : index
      %15 = vector.load %arg5[%c0_11, %c0_12] : memref<8x128xf32, #tpu.memory_space<vmem>>, vector<8x128xf32>
      tpu.vector_store %arg5[%c0_11, %c0_12], %14 {strides = array<i32>} : memref<8x128xf32, #tpu.memory_space<vmem>>, vector<8x128xf32>,
    } else {
    }
    %c0 = arith.constant 0 : index
    %c0_1 = arith.constant 0 : index
    %3 = vector.load %arg2[%c0, %c0_1] : memref<16x128xf32, #tpu.memory_space<vmem>>, vector<16x128xf32>
    %c0_2 = arith.constant 0 : index
    %c0_3 = arith.constant 0 : index
    %4 = vector.load %arg3[%c0_2, %c0_3] : memref<16x128xf32, #tpu.memory_space<vmem>>, vector<16x128xf32>
    %c0_4 = arith.constant 0 : index
    %c0_5 = arith.constant 0 : index
    %5 = vector.load %arg4[%c0_4, %c0_5] : memref<16x128xf32, #tpu.memory_space<vmem>>, vector<16x128xf32>
    %6 = arith.subf %3, %4 : vector<16x128xf32>
    %7 = math.absf %6 : vector<16x128xf32>
    %8 = arith.mulf %5, %7 : vector<16x128xf32>
    %c0_6 = arith.constant 0 : index
    %c0_7 = arith.constant 0 : index
    %9 = vector.load %arg5[%c0_6, %c0_7] : memref<8x128xf32, #tpu.memory_space<vmem>>, vector<8x128xf32>
    %10 = vector.shape_cast %8 : vector<16x128xf32> to vector<2x8x128xf32>
    %cst = arith.constant dense<0.000000e+00> : vector<8x128xf32>
    %11 = vector.multi_reduction <add>, %10, %cst [0] : vector<2x8x128xf32> to vector<8x128xf32>
    %12 = arith.addf %9, %11 : vector<8x128xf32>
    %c0_8 = arith.constant 0 : index
    %c0_9 = arith.constant 0 : index
    %13 = vector.load %arg5[%c0_8, %c0_9] : memref<8x128xf32, #tpu.memory_space<vmem>>, vector<8x128xf32>
    tpu.vector_store %arg5[%c0_8, %c0_9], %12 {strides = array<i32>} : memref<8x128xf32, #tpu.memory_space<vmem>>, vector<8x128xf32>,
    return
  }
  func.func @transform_0(%arg0: i32, %arg1: i32) -> (i32, i32) {
    %c1_i32 = arith.constant 1 : i32
    %0 = arith.muli %arg0, %c1_i32 : i32
    %1 = arith.addi %0, %arg1 : i32
    %c0_i32 = arith.constant 0 : i32
    %2 = arith.minsi %1, %c0_i32 : i32
    %c0_i32_0 = arith.constant 0 : i32
    %c0_i32_1 = arith.constant 0 : i32
    return %2, %c0_i32_0 : i32, i32
  }
  func.func @transform_1(%arg0: i32, %arg1: i32) -> (i32, i32) {
    %c1_i32 = arith.constant 1 : i32
    %0 = arith.muli %arg0, %c1_i32 : i32
    %1 = arith.addi %0, %arg1 : i32
    %c0_i32 = arith.constant 0 : i32
    %2 = arith.minsi %1, %c0_i32 : i32
    %c0_i32_0 = arith.constant 0 : i32
    %c0_i32_1 = arith.constant 0 : i32
    return %2, %c0_i32_0 : i32, i32
  }
  func.func @transform_2(%arg0: i32, %arg1: i32) -> (i32, i32) {
    %c1_i32 = arith.constant 1 : i32
    %0 = arith.muli %arg0, %c1_i32 : i32
    %1 = arith.addi %0, %arg1 : i32
    %c0_i32 = arith.constant 0 : i32
    %2 = arith.minsi %1, %c0_i32 : i32
    %c0_i32_0 = arith.constant 0 : i32
    %c0_i32_1 = arith.constant 0 : i32
    return %2, %c0_i32_0 : i32, i32
  }
  func.func @transform_3(%arg0: i32, %arg1: i32) -> (i32, i32) {
    %c0_i32 = arith.constant 0 : i32
    %c0_i32_0 = arith.constant 0 : i32
    return %arg0, %c0_i32 : i32, i32
  }
}

</mosaic_0001>

<bundles_post_ra>
// kernel: tpu_custom_call.1
= control target key start
LH: loop header
LB: loop body
LE: loop exit
PB: predicated region body
PF: predicated region fallthrough
CT: control target
= control target key end

     0   :  { %8 = vsyncpa [#allocation3], 0  ;;  %s320_s0 = inlined_call_operand.hbm [shape: f32[16,128], index: 0, kind: input, shape index: {}]   ;;  %s321_s1 = inlined_call_operand.hbm [shape: f32[16,128], index: 1, kind: input, shape index: {}]   ;;  %s322_s2 = inlined_call_operand.hbm [shape: f32[16,128], index: 2, kind: input, shape index: {}]   ;;  %s323_s3 = inlined_call_operand.hbm [shape: f32[8,128], index: 3, kind: output, shape index: {}]  }
   0x1   :  { %9 = vsyncpa [#allocation6], 0 }
   0x2   :  { %10 = vsyncpa [#allocation4], 0  ;;  %s230_s12 = smov [#allocation5]   ;;  %s231_s14 = smov [#allocation2]  }
   0x3   :  { %s40_s13 = sshll.u32 %s230_s12, 4  ;;  %s22_s15 = sshll.u32 %s231_s14, 4  ;;  %s41_s13 = int_to_ptr.vmem [resolvable:$true] %s40_s13  ;;  %s256_s15 = int_to_ptr.vmem [resolvable:$true] %s22_s15 }
   0x4   :  { %s136_s18 = scalar_lea.hbm %s321_s1, 256 }
   0x5   :  { %p137_p0 = scmp.ne.s32.totalorder %s321_s1, %s136_s18  ;;  %p140_p1 = scmp.lt.u32.totalorder %s136_s18, %s321_s1 }
   0x7   :  { %p142_p2 = pnand %p140_p1, %p137_p0 }
   0x9   :  { %145 = shalt.err (!%p142_p2)
}
   0xa   :  { %s146_s23 = scalar_lea.vmem %s41_s13, 256  ;;  %p151_p4 = scmp.lt.s32.totalorder %s41_s13, %s41_s13 }
   0xb   :  { %p147_p3 = scmp.ne.s32.totalorder %s41_s13, %s146_s23  ;;  %p152_p5 = scmp.lt.s32.totalorder %s146_s23, %s146_s23 }
   0xd   :  { %p153_p6 = por %p152_p5, %p151_p4 }
   0xf   :  { %p154_p7 = pnand %p153_p6, %p147_p3 }
  0x11   :  { %157 = shalt.err (!%p154_p7)
}
  0x12   :  { %s232_s24 = smov 128   ;;  %s233_s25 = smov 8  }
  0x13   :  { %46 = dma.hbm_to_vmem [thread:$0]  %s321_s1, 256, %s41_s13, [#allocation6], %s232_s24, %s232_s24, %s233_s25  }
  0x14   :  { %s158_s30 = scalar_lea.hbm %s320_s0, 256 }
  0x15   :  { %p159_p8 = scmp.ne.s32.totalorder %s320_s0, %s158_s30  ;;  %p162_p9 = scmp.lt.u32.totalorder %s158_s30, %s320_s0 }
  0x17   :  { %p164_p10 = pnand %p162_p9, %p159_p8 }
  0x19   :  { %167 = shalt.err (!%p164_p10)
}
  0x1a   :  { %s168_s8 = scalar_lea.vmem %s256_s15, 256  ;;  %p173_p12 = scmp.lt.s32.totalorder %s256_s15, %s256_s15 }
  0x1b   :  { %p169_p11 = scmp.ne.s32.totalorder %s256_s15, %s168_s8  ;;  %p174_p13 = scmp.lt.s32.totalorder %s168_s8, %s168_s8 }
  0x1d   :  { %p175_p0 = por %p174_p13, %p173_p12 }
  0x1f   :  { %p176_p1 = pnand %p175_p0, %p169_p11 }
  0x21   :  { %179 = shalt.err (!%p176_p1)
}
  0x22   :  { %28 = dma.hbm_to_vmem [thread:$0]  %s320_s0, 256, %s256_s15, [#allocation3], %s232_s24, %s232_s24, %s233_s25  }
  0x23   :  { %s234_s10 = smov [#allocation7]   ;;  %s180_s14 = scalar_lea.hbm %s322_s2, 256 }
  0x24   :  { %s58_s11 = sshll.u32 %s234_s10, 4  ;;  %p181_p2 = scmp.ne.s32.totalorder %s322_s2, %s180_s14  ;;  %s59_s11 = int_to_ptr.vmem [resolvable:$true] %s58_s11 }
  0x25   :  { %p184_p3 = scmp.lt.u32.totalorder %s180_s14, %s322_s2 }
  0x27   :  { %p186_p4 = pnand %p184_p3, %p181_p2 }
  0x29   :  { %189 = shalt.err (!%p186_p4)
}
  0x2a   :  { %s190_s20 = scalar_lea.vmem %s59_s11, 256  ;;  %p195_p6 = scmp.lt.s32.totalorder %s59_s11, %s59_s11 }
  0x2b   :  { %p191_p5 = scmp.ne.s32.totalorder %s59_s11, %s190_s20  ;;  %p196_p7 = scmp.lt.s32.totalorder %s190_s20, %s190_s20 }
  0x2d   :  { %p197_p8 = por %p196_p7, %p195_p6 }
  0x2f   :  { %p198_p9 = pnand %p197_p8, %p191_p5 }
  0x31   :  { %201 = shalt.err (!%p198_p9)
}
  0x32   :  { %64 = dma.hbm_to_vmem [thread:$0]  %s322_s2, 256, %s59_s11, [#allocation6], %s232_s24, %s232_s24, %s233_s25  }
  0x33   :  { %224 = dma.done.wait [#allocation3], 256  }
  0x34   :  { %225 = vsyncadd [#allocation3], 4294967040 }
  0x35   :  { %226 = dma.done.wait [#allocation6], 512  }
  0x36   :  { %227 = vsyncadd [#allocation6], 4294966784  ;;  %v91_v0 = vld [vmem:[#allocation2] sm:$0xff]  ;;  %v92_v1 = vld [vmem:[#allocation2 + $0x8] sm:$0xff]  ;;  %s235_s21 = smov [#allocation8]  }
  0x37   :  { %v93_v2 = vld [vmem:[#allocation5] sm:$0xff]  ;;  %v94_v3 = vld [vmem:[#allocation5 + $0x8] sm:$0xff]  ;;  %v95_v5 = vld [vmem:[#allocation7] sm:$0xff]  ;;  %s113_s22 = sshll.u32 %s235_s21, 4  ;;  %s114_s22 = int_to_ptr.vmem [resolvable:$true] %s113_s22 }
  0x38   :  { %v97_v4 = vsub.f32 %v91_v0, %v93_v2  ;;  %v98_v6 = vsub.f32 %v92_v1, %v94_v3  ;;  %v96_v7 = vld [vmem:[#allocation7 + $0x8] sm:$0xff]  ;;  %s202_s2 = scalar_lea.vmem %s114_s22, 128  ;;  %p207_p11 = scmp.lt.s32.totalorder %s114_s22, %s114_s22 }
  0x39   :  { %p203_p10 = scmp.ne.s32.totalorder %s114_s22, %s202_s2  ;;  %p208_p12 = scmp.lt.s32.totalorder %s202_s2, %s202_s2 }
  0x3a   :  { %v99_v8 = vand.u32 2147483647, %v97_v4  ;;  %v100_v9 = vand.u32 2147483647, %v98_v6 }
  0x3b   :  { %p209_p13 = por %p208_p12, %p207_p11 }
  0x3c   :  { %v101_v10 = vmul.f32 %v99_v8, %v95_v5  ;;  %v102_v11 = vmul.f32 %v100_v9, %v96_v7 }
  0x3d   :  { %p210_p0 = pnand %p209_p13, %p203_p10 }
  0x3e   :  { %v104_v12 = vadd.f32 %v102_v11, %v101_v10 }
  0x40   :  { %106 = vst [vmem:[#allocation8] sm:$0xff] %v104_v12 }
  0x41   :  { %213 = shalt.err (!%p210_p0)
}
  0x42   :  { %s214_s25 = scalar_lea.hbm %s323_s3, 128 }
  0x43   :  { %p215_p1 = scmp.ne.s32.totalorder %s323_s3, %s214_s25  ;;  %p218_p2 = scmp.lt.u32.totalorder %s214_s25, %s323_s3 }
  0x45   :  { %p220_p3 = pnand %p218_p2, %p215_p1 }
  0x47   :  { %223 = shalt.err (!%p220_p3)
}
  0x48   :  { %116 = dma.vmem_to_hbm [thread:$0]  %s114_s22, 128, %s323_s3, [#allocation4]  }
  0x49   :  { %228 = dma.done.wait [#allocation4], 128  }
  0x4a   :  { %229 = vsyncadd [#allocation4], 4294967168 }
  0x4b   :  { %120 = vsyncpa [#allocation3], 1 }
  0x4c   :  { %121 = vsyncpa [#allocation6], 1 }
  0x4d   :  { %122 = vsyncpa [#allocation4], 1 }

</bundles_post_ra>
